<compile_context>
chip_gen: v6e
topology: v6e:2x2x1
jax: 0.10.0
libtpu: 0.0.40
codegen_flags: <defaults>
</compile_context>

<pallas_src>
import math

import jax
import jax.numpy as jnp
from jax.experimental import pallas as pl
from jax.experimental.pallas import tpu as pltpu


def _round_up(x, n):
    return (x + n - 1) // n * n


# ----------------------------------------------------------------------------
# Kernel: fused linear_1 -> ReLU -> (dropout = identity) -> linear_2
# ----------------------------------------------------------------------------
def feedforward_kernel(x_ref, w1_ref, b1_ref, w2_ref, b2_ref, o_ref, acc_ref):
    """Grid = (M tiles, d_ff tiles).  The d_ff axis is the reduction axis of
    the second matmul, so the hidden activation h lives only in VMEM."""
    f = pl.program_id(1)

    @pl.when(f == 0)
    def _():
        acc_ref[...] = jnp.zeros_like(acc_ref)

    # h_tile = relu(x @ W1[:, f_tile] + b1[f_tile])        -> [tm, tf]
    h = jnp.dot(x_ref[...], w1_ref[...], preferred_element_type=jnp.float32)
    h = jnp.maximum(h + b1_ref[...], 0.0)

    # y += h_tile @ W2[f_tile, :]                           -> [tm, d_model]
    acc_ref[...] += jnp.dot(h.astype(w2_ref.dtype), w2_ref[...],
                            preferred_element_type=jnp.float32)

    @pl.when(f == pl.num_programs(1) - 1)
    def _():
        o_ref[...] = (acc_ref[...] + b2_ref[...]).astype(o_ref.dtype)


# ----------------------------------------------------------------------------
# Wrapper
# ----------------------------------------------------------------------------
def feedforward(x, w1, b1, w2, b2, *, block_m=256, block_f=512):
    """x: [..., d_model]; w1: [d_model, d_ff]; b1: [d_ff];
    w2: [d_ff, d_model]; b2: [d_model]."""
    d_model = x.shape[-1]
    d_ff = w1.shape[1]
    assert w1.shape == (d_model, d_ff)
    assert b1.shape == (d_ff,)
    assert w2.shape == (d_ff, d_model)
    assert b2.shape == (d_model,)
    assert d_model % 128 == 0 and d_ff % 128 == 0, (
        "feature dims must be multiples of 128 for lane-dense tiles")

    # Fold all leading dims into the matmul M dimension.
    orig_shape = x.shape
    x2 = x.reshape(-1, d_model)
    m = x2.shape[0]

    # Row tile: multiple of 8 (sublane); pad rows if needed.
    tm = min(block_m, _round_up(m, 8))
    mp = _round_up(m, tm)
    if mp != m:
        x2 = jnp.pad(x2, ((0, mp - m), (0, 0)))

    # d_ff tile (reduction axis of the fused kernel), lane-aligned divisor.
    tf = min(block_f, d_ff)
    while d_ff % tf != 0:
        tf //= 2
    assert tf >= 128, "d_ff must have a lane-aligned (>=128) divisor tile"

    # Biases as 2-D lane-dense rows so they broadcast inside the kernel.
    b1_2d = b1.reshape(1, d_ff)
    b2_2d = b2.reshape(1, d_model)

    grid = (mp // tm, d_ff // tf)
    out = pl.pallas_call(
        feedforward_kernel,
        grid=grid,
        in_specs=[
            pl.BlockSpec((tm, d_model), lambda i, f: (i, 0)),   # x row tile
            pl.BlockSpec((d_model, tf), lambda i, f: (0, f)),   # W1 column tile
            pl.BlockSpec((1, tf), lambda i, f: (0, f)),         # b1 tile
            pl.BlockSpec((tf, d_model), lambda i, f: (f, 0)),   # W2 row tile
            pl.BlockSpec((1, d_model), lambda i, f: (0, 0)),    # b2
        ],
        out_specs=pl.BlockSpec((tm, d_model), lambda i, f: (i, 0)),
        out_shape=jax.ShapeDtypeStruct((mp, d_model), x.dtype),
        scratch_shapes=[pltpu.VMEM((tm, d_model), jnp.float32)],
        compiler_params=pltpu.CompilerParams(
            dimension_semantics=("parallel", "arbitrary")),
    )(x2, w1, b1_2d, w2, b2_2d)

    return out[:m].reshape(orig_shape)


# ----------------------------------------------------------------------------
# Deterministic example (small, lane-aligned shapes implied by the module)
# ----------------------------------------------------------------------------
if __name__ == "__main__":
    key = jax.random.PRNGKey(0)
    k_x, k_w1, k_b1, k_w2, k_b2 = jax.random.split(key, 5)

    B, S, D_MODEL, D_FF = 2, 8, 128, 1024

    # torch.nn.Linear-style init (uniform +/- 1/sqrt(fan_in)), weights [in, out].
    bound1 = 1.0 / math.sqrt(D_MODEL)
    bound2 = 1.0 / math.sqrt(D_FF)
    w1 = jax.random.uniform(k_w1, (D_MODEL, D_FF), jnp.float32, -bound1, bound1)
    b1 = jax.random.uniform(k_b1, (D_FF,), jnp.float32, -bound1, bound1)
    w2 = jax.random.uniform(k_w2, (D_FF, D_MODEL), jnp.float32, -bound2, bound2)
    b2 = jax.random.uniform(k_b2, (D_MODEL,), jnp.float32, -bound2, bound2)
    x = jax.random.normal(k_x, (B, S, D_MODEL), jnp.float32)

    fwd = jax.jit(feedforward)
    y = fwd(x, w1, b1, w2, b2)
    jax.block_until_ready(y)

    # Reference (pure JAX): relu(x @ W1 + b1) @ W2 + b2  (dropout = identity).
    y_ref = jnp.maximum(x @ w1 + b1, 0.0) @ w2 + b2

    assert y.shape == (B, S, D_MODEL)
    assert jnp.allclose(y, y_ref, rtol=1e-2, atol=1e-2), (
        f"max abs err {float(jnp.max(jnp.abs(y - y_ref)))}")
    # TODO(synk): train-mode nn.Dropout (random masking / 1/(1-p) scaling) is not
    # implemented; inference semantics (identity) are used.
    print("KERNEL_OK")
</pallas_src>

<mosaic_0001>
module attributes {stable_mosaic.version = 11 : i64} {
  func.func @feedforward_kernel(%arg0: i32, %arg1: i32, %arg2: memref<16x128xf32, #tpu.memory_space<vmem>>, %arg3: memref<128x512xf32, #tpu.memory_space<vmem>>, %arg4: memref<1x512xf32, #tpu.memory_space<vmem>>, %arg5: memref<512x128xf32, #tpu.memory_space<vmem>>, %arg6: memref<1x128xf32, #tpu.memory_space<vmem>>, %arg7: memref<16x128xf32, #tpu.memory_space<vmem>>, %arg8: memref<16x128xf32, #tpu.memory_space<vmem>>) attributes {dimension_semantics = [#tpu.dimension_semantics<parallel>, #tpu.dimension_semantics<arbitrary>], iteration_bounds = array<i64: 1, 2>, scalar_prefetch = 0 : i64, scratch_operands = 1 : i64, tpu.core_type = #tpu.core_type<tc>, window_params = [{transform_indices = @transform_0, window_bounds = array<i64: 16, 128>}, {transform_indices = @transform_1, window_bounds = array<i64: 128, 512>}, {transform_indices = @transform_2, window_bounds = array<i64: 1, 512>}, {transform_indices = @transform_3, window_bounds = array<i64: 512, 128>}, {pipeline_mode = #tpu.pipeline_mode<synchronous>, transform_indices = @transform_4, window_bounds = array<i64: 1, 128>}, {transform_indices = @transform_5, window_bounds = array<i64: 16, 128>}]} {
    %c0_i32 = arith.constant 0 : i32
    %0 = arith.cmpi eq, %arg1, %c0_i32 : i32
    %1 = arith.extui %0 : i1 to i32
    %c0_i32_0 = arith.constant 0 : i32
    %2 = arith.cmpi ne, %1, %c0_i32_0 : i32
    scf.if %2 {
      %cst_15 = arith.constant 0.000000e+00 : f32
      %19 = vector.broadcast %cst_15 : f32 to vector<16x128xf32>
      %c0_16 = arith.constant 0 : index
      %c0_17 = arith.constant 0 : index
      %20 = vector.load %arg8[%c0_16, %c0_17] : memref<16x128xf32, #tpu.memory_space<vmem>>, vector<16x128xf32>
      tpu.vector_store %arg8[%c0_16, %c0_17], %19 {strides = array<i32>} : memref<16x128xf32, #tpu.memory_space<vmem>>, vector<16x128xf32>,
    } else {
    }
    %c0 = arith.constant 0 : index
    %c0_1 = arith.constant 0 : index
    %3 = vector.load %arg2[%c0, %c0_1] : memref<16x128xf32, #tpu.memory_space<vmem>>, vector<16x128xf32>
    %c0_2 = arith.constant 0 : index
    %c0_3 = arith.constant 0 : index
    %4 = vector.load %arg3[%c0_2, %c0_3] : memref<128x512xf32, #tpu.memory_space<vmem>>, vector<128x512xf32>
    %cst = arith.constant dense<0.000000e+00> : vector<16x512xf32>
    %5 = tpu.matmul %3, %4, %cst {dimension_numbers = #tpu.dot_dimension_numbers<[1], [0], [0], [1], [0, 0, 1, 1], [], []>} : vector<16x128xf32>, vector<128x512xf32>, vector<16x512xf32> -> vector<16x512xf32>
    %c0_4 = arith.constant 0 : index
    %c0_5 = arith.constant 0 : index
    %6 = vector.load %arg4[%c0_4, %c0_5] : memref<1x512xf32, #tpu.memory_space<vmem>>, vector<1x512xf32>
    %7 = vector.broadcast %6 : vector<1x512xf32> to vector<16x512xf32>
    %8 = arith.addf %5, %7 : vector<16x512xf32>
    %cst_6 = arith.constant 0.000000e+00 : f32
    %9 = vector.broadcast %cst_6 : f32 to vector<16x512xf32>
    %10 = arith.maximumf %8, %9 : vector<16x512xf32>
    %c0_7 = arith.constant 0 : index
    %c0_8 = arith.constant 0 : index
    %11 = vector.load %arg8[%c0_7, %c0_8] : memref<16x128xf32, #tpu.memory_space<vmem>>, vector<16x128xf32>
    %c0_9 = arith.constant 0 : index
    %c0_10 = arith.constant 0 : index
    %12 = vector.load %arg5[%c0_9, %c0_10] : memref<512x128xf32, #tpu.memory_space<vmem>>, vector<512x128xf32>
    %cst_11 = arith.constant dense<0.000000e+00> : vector<16x128xf32>
    %13 = tpu.matmul %10, %12, %cst_11 {dimension_numbers = #tpu.dot_dimension_numbers<[1], [0], [0], [1], [0, 0, 1, 1], [], []>} : vector<16x512xf32>, vector<512x128xf32>, vector<16x128xf32> -> vector<16x128xf32>
    %14 = arith.addf %11, %13 : vector<16x128xf32>
    %c0_12 = arith.constant 0 : index
    %c0_13 = arith.constant 0 : index
    %15 = vector.load %arg8[%c0_12, %c0_13] : memref<16x128xf32, #tpu.memory_space<vmem>>, vector<16x128xf32>
    tpu.vector_store %arg8[%c0_12, %c0_13], %14 {strides = array<i32>} : memref<16x128xf32, #tpu.memory_space<vmem>>, vector<16x128xf32>,
    %c1_i32 = arith.constant 1 : i32
    %16 = arith.cmpi eq, %arg1, %c1_i32 : i32
    %17 = arith.extui %16 : i1 to i32
    %c0_i32_14 = arith.constant 0 : i32
    %18 = arith.cmpi ne, %17, %c0_i32_14 : i32
    scf.if %18 {
      %c0_15 = arith.constant 0 : index
      %c0_16 = arith.constant 0 : index
      %19 = vector.load %arg8[%c0_15, %c0_16] : memref<16x128xf32, #tpu.memory_space<vmem>>, vector<16x128xf32>
      %c0_17 = arith.constant 0 : index
      %c0_18 = arith.constant 0 : index
      %20 = vector.load %arg6[%c0_17, %c0_18] : memref<1x128xf32, #tpu.memory_space<vmem>>, vector<1x128xf32>
      %21 = vector.broadcast %20 : vector<1x128xf32> to vector<16x128xf32>
      %22 = arith.addf %19, %21 : vector<16x128xf32>
      %c0_19 = arith.constant 0 : index
      %c0_20 = arith.constant 0 : index
      %23 = vector.load %arg7[%c0_19, %c0_20] : memref<16x128xf32, #tpu.memory_space<vmem>>, vector<16x128xf32>
      tpu.vector_store %arg7[%c0_19, %c0_20], %22 {strides = array<i32>} : memref<16x128xf32, #tpu.memory_space<vmem>>, vector<16x128xf32>,
    } else {
    }
    return
  }
  func.func @transform_0(%arg0: i32, %arg1: i32) -> (i32, i32) {
    %c0_i32 = arith.constant 0 : i32
    %c0_i32_0 = arith.constant 0 : i32
    return %arg0, %c0_i32 : i32, i32
  }
  func.func @transform_1(%arg0: i32, %arg1: i32) -> (i32, i32) {
    %c0_i32 = arith.constant 0 : i32
    %c0_i32_0 = arith.constant 0 : i32
    return %c0_i32, %arg1 : i32, i32
  }
  func.func @transform_2(%arg0: i32, %arg1: i32) -> (i32, i32) {
    %c0_i32 = arith.constant 0 : i32
    %c0_i32_0 = arith.constant 0 : i32
    return %c0_i32, %arg1 : i32, i32
  }
  func.func @transform_3(%arg0: i32, %arg1: i32) -> (i32, i32) {
    %c0_i32 = arith.constant 0 : i32
    %c0_i32_0 = arith.constant 0 : i32
    return %arg1, %c0_i32 : i32, i32
  }
  func.func @transform_4(%arg0: i32, %arg1: i32) -> (i32, i32) {
    %c0_i32 = arith.constant 0 : i32
    %c0_i32_0 = arith.constant 0 : i32
    %c0_i32_1 = arith.constant 0 : i32
    return %c0_i32, %c0_i32_0 : i32, i32
  }
  func.func @transform_5(%arg0: i32, %arg1: i32) -> (i32, i32) {
    %c0_i32 = arith.constant 0 : i32
    %c0_i32_0 = arith.constant 0 : i32
    return %arg0, %c0_i32 : i32, i32
  }
}

</mosaic_0001>

<bundles_post_ra>
// kernel: feedforward.1
= control target key start
LH: loop header
LB: loop body
LE: loop exit
PB: predicated region body
PF: predicated region fallthrough
CT: control target
= control target key end

     0   :  { %10 = vsyncpa [#allocation4], 0  ;;  %s1646_s0 = inlined_call_operand.hbm [shape: f32[16,128], index: 0, kind: input, shape index: {}]   ;;  %s1647_s1 = inlined_call_operand.hbm [shape: f32[128,1024], index: 1, kind: input, shape index: {}]   ;;  %s1648_s2 = inlined_call_operand.vmem [shape: f32[1,1024], index: 2, kind: input, shape index: {}]   ;;  %s1649_s3 = inlined_call_operand.hbm [shape: f32[1024,128], index: 3, kind: input, shape index: {}]   ;;  %s1650_s4 = inlined_call_operand.vmem [shape: f32[1,128], index: 4, kind: input, shape index: {}]   ;;  %s1651_s5 = inlined_call_operand.hbm [shape: f32[16,128], index: 5, kind: output, shape index: {}]  }
   0x1   :  { %11 = vsyncpa [#allocation7], 0 }
   0x2   :  { %13 = vsyncpa [#allocation7 + $0x1], 0 }
   0x3   :  { %14 = vsyncpa [#allocation5], 0  ;;  %s1336_s18 = smov 0   ;;  %s1338_s19 = smov 0  }
   0x4   :  { %s1340_s20 = smov 0   ;;  %s1342_s21 = smov 0  }
   0x5   :  { %s1344_s22 = smov 0   ;;  %s1346_s23 = smov 0  }
   0x6 LB: > { %s29_s24 = sadd.s32 1, %s1287_s22  ;;  %s65_s25 = sadd.s32 1, %s1279_s20  ;;  %s1291_s23 = sphi %s1346_s23, %s20_s23   ;;  %s1287_s22 = sphi %s1344_s22, %s1660_s22   ;;  %s1283_s21 = sphi %s1342_s21, %s1659_s21   ;;  %s1279_s20 = sphi %s1340_s20, %s1658_s20   ;;  %s1275_s19 = sphi %s1338_s19, %s1657_s19   ;;  %s1271_s18 = sphi %s1336_s18, %s1656_s18  }
   0x7   : > { %p30_p0 = scmp.ge.s32.totalorder %s29_s24, 2  ;;  %p72_p1 = scmp.ne.s32.totalorder %s1279_s20, %s1275_s19 }
   0x8   : > { %p73_p2 = scmp.eq.s32.totalorder %s1291_s23, 0  ;;  %p1064_p4 = scmp.lt.s32.totalorder %s1291_s23, 2 }
   0x9   : > { %s1662_s24 = smov (%p30_p0, %s29_s24), 0  ;;  %s220_s27 = sand.u32 1, %s1291_s23  }
   0xa   : > { %p74_p3 = por %p73_p2, %p72_p1  ;;  %s62_s26 = ssub.s32 %s1287_s22, %s1662_s24 }
   0xb   : > { %p63_p5 = scmp.eq.s32.totalorder %s62_s26, 0  ;;  %s222_s28 = sand.u32 1, %s1279_s20  }
   0xc   : > { %s962_s29 = sshll.u32 %s1287_s22, 9  ;;  %s1382_s6 = sshll.u32 %s222_s28, 9 }
   0xd   : > { %s1380_s30 = scalar_select %p63_p5, %s1279_s20, %s65_s25  }
   0xe   : > { %s230_s9 = scalar_lea.hbm %s1647_s1, %s962_s29  ;;  %p1387_p6 = pnand %p1064_p4, %p74_p3 }
   0xf   : > { %s224_s11 = scalar_lea.vmem [#allocation6], %s1382_s6  ;;  %s1392_s13 = scalar_lea.sflag [#allocation7], %s220_s27 }
  0x10   : > { %s231_s12 = sshll.u32 %s224_s11, 4  ;;  %p1129_p7 = pneg %p1387_p6  ;;  %s232_s12 = int_to_ptr.vmem [resolvable:$true] %s231_s12 }
  0x11   : > { %s1140_s14 = scalar_lea.vmem %s232_s12, 8192  ;;  %s1293_s15 = smov [#allocation6]  }
  0x12   : > { %p1141_p8 = scmp.ne.s32.totalorder %s232_s12, %s1140_s14  ;;  %s1145_s16 = sshll.u32 %s1293_s15, 4  ;;  %s1146_s16 = int_to_ptr.vmem [resolvable:$false] %s1145_s16 }
  0x13   : > { %s1147_s17 = scalar_lea.vmem %s1146_s16, 16384  ;;  %p1148_p11 = scmp.lt.s32.totalorder %s232_s12, %s1146_s16 }
  0x14   : > { %p1143_p9 = pnand %p1141_p8, %p1129_p7  ;;  %p1149_p12 = scmp.lt.s32.totalorder %s1147_s17, %s1140_s14 }
  0x16   : > { %p1144_p10 = pneg %p1143_p9  ;;  %p1150_p13 = por %p1149_p12, %p1148_p11 }
  0x18   : > { %p1151_p0 = pnand %p1150_p13, %p1144_p10 }
  0x1a   : > { %1154 = shalt.err (!%p1151_p0)
}
  0x1b   : > { %s1294_s25 = smov 1024   ;;  %s1295_s26 = smov 512  }
  0x1c   : > { %s1296_s27 = smov 32   ;;  %s1403_s28 = sadd.s32 4294967295, %s1291_s23  }
  0x1d   : > { %1059 = dma.hbm_to_vmem [thread:$0]  (!%p1387_p6), %s230_s9, 8192, %s232_s12, %s1392_s13, %s1294_s25, %s1295_s26, %s1296_s27  }
  0x1e   : > { %p78_p1 = scmp.ne.s32.totalorder %s1275_s19, %s1271_s18  ;;  %p79_p2 = scmp.eq.s32.totalorder %s1403_s28, 0 }
  0x1f   : > { %p941_p3 = scmp.ge.s32.totalorder %s1291_s23, 1  ;;  %p188_p4 = scmp.lt.s32.totalorder %s1291_s23, 3 }
  0x20   : > { %p1412_p5 = por %p79_p2, %p78_p1  ;;  %s1297_s8 = smov [#allocation3]  }
  0x21   : > { %p1416_p8 = pnand %p941_p3, %p188_p4  ;;  %s203_s9 = sshll.u32 %s1297_s8, 4  ;;  %s204_s9 = int_to_ptr.vmem [resolvable:$true] %s203_s9 }
  0x22   : > { %s963_s11 = sshll.u32 %s1287_s22, 13  ;;  %s253_s16 = scalar_lea.vmem [#allocation8], %s1382_s6 }
  0x23   : > { %p1052_p9 = pneg %p1416_p8  ;;  %s1432_s15 = scalar_lea.hbm %s1649_s3, %s963_s11 }
  0x24   : > { %s260_s17 = sshll.u32 %s253_s16, 4  ;;  %s1166_s25 = scalar_lea.vmem %s204_s9, 256  ;;  %s1435_s17 = int_to_ptr.vmem [resolvable:$true] %s260_s17 }
  0x25   : > { %p1425_p10 = pnand %p1052_p9, %p79_p2  ;;  %p1167_p12 = scmp.ne.s32.totalorder %s204_s9, %s1166_s25 }
  0x26   : > { %p1174_p1 = scmp.lt.s32.totalorder %s204_s9, %s204_s9  ;;  %p1175_p3 = scmp.lt.s32.totalorder %s1166_s25, %s1166_s25 }
  0x27   : > { %p1157_p11 = pneg %p1425_p10 }
  0x28   : > { %p1176_p4 = por %p1175_p3, %p1174_p1 }
  0x29   : > { %p1169_p13 = pnand %p1167_p12, %p1157_p11 }
  0x2b   : > { %p1170_p0 = pneg %p1169_p13 }
  0x2d   : > { %p1177_p9 = pnand %p1176_p4, %p1170_p0 }
  0x2f   : > { %1180 = shalt.err (!%p1177_p9)
}
  0x30   : > { %s1298_s26 = smov 128   ;;  %s1299_s6 = smov 8  }
  0x31   : > { %1055 = dma.hbm_to_vmem [thread:$0]  (!%p1425_p10), %s1646_s0, 256, %s204_s9, [#allocation4], %s1298_s26, %s1298_s26, %s1299_s6  }
  0x32   : > { %s1194_s11 = scalar_lea.vmem %s1435_s17, 8192  ;;  %s1300_s12 = smov [#allocation8]  }
  0x33   : > { %p1195_p11 = scmp.ne.s32.totalorder %s1435_s17, %s1194_s11  ;;  %s1199_s14 = sshll.u32 %s1300_s12, 4  ;;  %s1200_s14 = int_to_ptr.vmem [resolvable:$false] %s1199_s14 }
  0x34   : > { %s1201_s16 = scalar_lea.vmem %s1200_s14, 16384  ;;  %p1202_p0 = scmp.lt.s32.totalorder %s1435_s17, %s1200_s14 }
  0x35   : > { %p1197_p12 = pnand %p1195_p11, %p1129_p7  ;;  %p1203_p1 = scmp.lt.s32.totalorder %s1201_s16, %s1194_s11 }
  0x37   : > { %p1198_p13 = pneg %p1197_p12  ;;  %p1204_p3 = por %p1203_p1, %p1202_p0 }
  0x39   : > { %p1205_p4 = pnand %p1204_p3, %p1198_p13 }
  0x3b   : > { %1208 = shalt.err (!%p1205_p4)
}
  0x3c   : > { %1062 = dma.hbm_to_vmem [thread:$0]  (!%p1387_p6), %s1432_s15, 8192, %s1435_s17, %s1392_s13, %s1298_s26, %s1298_s26, %s1299_s6  }
  0x3d   : > { %272 = sbr.rel (%p1416_p8) target bundleno = 547 (0x223), region = 40 }
  0x42   : > { %1258 = dma.done.wait (%p79_p2), [#allocation4], 256  }
  0x43   : > { %1260 = vsyncadd (%p79_p2), [#allocation4], 4294967040  ;;  %s278_s9 = sand.u32 1, %s1403_s28   ;;  %s280_s18 = sand.u32 1, %s1275_s19  }
  0x44   : > { %s952_s25 = sshll.u32 %s280_s18, 9  ;;  %s279_s10 = scalar_lea.sflag [#allocation7], %s278_s9 }
  0x45   : > { %s1463_s27 = scalar_lea.vmem [#allocation6], %s952_s25 }
  0x46   : > { %1262 = dma.done.wait (%p1412_p5), %s279_s10, 16384  }
  0x47   : > { %1264 = vsyncadd (%p1412_p5), %s279_s10, 4294950912  ;;  %s954_s13 = sshll.u32 %s1283_s21, 2  ;;  %s1476_s26 = scalar_lea.vmem [#allocation8], %s952_s25 }
  0x48   : > { %p325_p6 = scmp.lt.s32.totalorder %s954_s13, 7  ;;  %p955_p7 = scmp.ne.s32.totalorder %s1283_s21, 0 }
  0x4a   : > { %s1664_s13 = smov (!%p325_p6, %s954_s13), 7  ;;  %334 = sbr.rel (%p955_p7) target bundleno = 81 (0x51), region = 56 }
  0x4b   : > { %s327_s17 = scalar_lea.vmem %s1648_s2, %s1664_s13 }
  0x4f   : > { %v1301_v0 = vmov 0.0  }
  0x50   : > { %335 = vst [vmem:[#allocation2] sm:$0xff] %v1301_v0  ;;  %336 = vst [vmem:[#allocation2 + $0x8] sm:$0xff] %v1301_v0 }
  0x51 PF: > { %v400_v1 = vld [vmem:[%s1463_s27 + $0x1e8] sm:$0xff]  ;;  %v402_v2 = vld [vmem:[%s1463_s27 + $0x1f8] sm:$0xff]  ;;  %v399_v3 = vld [vmem:[%s1463_s27 + $0x1e0] sm:$0xff]  ;;  %p956_p2 = scmp.ne.s32.totalorder %s1283_s21, 1 }
  0x52   : > { %425 = vmatprep.subr.mxu0 %v400_v1  ;;  %502 = vmatprep.subr.mxu1 %v402_v2  ;;  %v401_v4 = vld [vmem:[%s1463_s27 + $0x1f0] sm:$0xff]  ;;  %v396_v5 = vld [vmem:[%s1463_s27 + $0x1c8] sm:$0xff]  ;;  %v398_v6 = vld [vmem:[%s1463_s27 + $0x1d8] sm:$0xff]  ;;  %v1302_v2 = vmov 0.0  }
  0x53   : > { %426 = vmatpush1.msra.mxu0 %v399_v3  ;;  %503 = vmatpush1.msra.mxu1 %v401_v4  ;;  %v395_v7 = vld [vmem:[%s1463_s27 + $0x1c0] sm:$0xff]  ;;  %v397_v8 = vld [vmem:[%s1463_s27 + $0x1d0] sm:$0xff]  ;;  %v392_v9 = vld [vmem:[%s1463_s27 + $0x1a8] sm:$0xff] }
  0x54   : > { %427 = vmatprep.subr.mxu0 %v396_v5  ;;  %504 = vmatprep.subr.mxu1 %v398_v6  ;;  %v394_v10 = vld [vmem:[%s1463_s27 + $0x1b8] sm:$0xff]  ;;  %v391_v11 = vld [vmem:[%s1463_s27 + $0x1a0] sm:$0xff]  ;;  %v393_v12 = vld [vmem:[%s1463_s27 + $0x1b0] sm:$0xff] }
  0x55   : > { %428 = vmatpush1.msra.mxu0 %v395_v7  ;;  %505 = vmatpush1.msra.mxu1 %v397_v8  ;;  %v388_v13 = vld [vmem:[%s1463_s27 + $0x188] sm:$0xff]  ;;  %v390_v14 = vld [vmem:[%s1463_s27 + $0x198] sm:$0xff]  ;;  %v387_v15 = vld [vmem:[%s1463_s27 + $0x180] sm:$0xff] }
  0x56   : > { %429 = vmatprep.subr.mxu0 %v392_v9  ;;  %506 = vmatprep.subr.mxu1 %v394_v10  ;;  %v389_v16 = vld [vmem:[%s1463_s27 + $0x190] sm:$0xff]  ;;  %v384_v17 = vld [vmem:[%s1463_s27 + $0x168] sm:$0xff]  ;;  %v386_v18 = vld [vmem:[%s1463_s27 + $0x178] sm:$0xff] }
  0x57   : > { %430 = vmatpush1.msra.mxu0 %v391_v11  ;;  %507 = vmatpush1.msra.mxu1 %v393_v12  ;;  %v383_v19 = vld [vmem:[%s1463_s27 + $0x160] sm:$0xff]  ;;  %v385_v20 = vld [vmem:[%s1463_s27 + $0x170] sm:$0xff]  ;;  %v380_v21 = vld [vmem:[%s1463_s27 + $0x148] sm:$0xff] }
  0x58   : > { %431 = vmatprep.subr.mxu0 %v388_v13  ;;  %508 = vmatprep.subr.mxu1 %v390_v14  ;;  %v382_v22 = vld [vmem:[%s1463_s27 + $0x158] sm:$0xff]  ;;  %v379_v23 = vld [vmem:[%s1463_s27 + $0x140] sm:$0xff]  ;;  %v381_v24 = vld [vmem:[%s1463_s27 + $0x150] sm:$0xff] }
  0x59   : > { %432 = vmatpush1.msra.mxu0 %v387_v15  ;;  %509 = vmatpush1.msra.mxu1 %v389_v16  ;;  %v376_v25 = vld [vmem:[%s1463_s27 + $0x128] sm:$0xff]  ;;  %v378_v26 = vld [vmem:[%s1463_s27 + $0x138] sm:$0xff]  ;;  %v375_v27 = vld [vmem:[%s1463_s27 + $0x120] sm:$0xff] }
  0x5a   : > { %433 = vmatprep.subr.mxu0 %v384_v17  ;;  %510 = vmatprep.subr.mxu1 %v386_v18  ;;  %v377_v28 = vld [vmem:[%s1463_s27 + $0x130] sm:$0xff]  ;;  %v372_v29 = vld [vmem:[%s1463_s27 + $0x108] sm:$0xff]  ;;  %v374_v30 = vld [vmem:[%s1463_s27 + $0x118] sm:$0xff] }
  0x5b   : > { %434 = vmatpush1.msra.mxu0 %v383_v19  ;;  %511 = vmatpush1.msra.mxu1 %v385_v20  ;;  %v371_v31 = vld [vmem:[%s1463_s27 + $0x100] sm:$0xff]  ;;  %v373_v32 = vld [vmem:[%s1463_s27 + $0x110] sm:$0xff]  ;;  %v368_v33 = vld [vmem:[%s1463_s27 + $0xe8] sm:$0xff] }
  0x5c   : > { %435 = vmatprep.subr.mxu0 %v380_v21  ;;  %512 = vmatprep.subr.mxu1 %v382_v22  ;;  %v370_v34 = vld [vmem:[%s1463_s27 + $0xf8] sm:$0xff]  ;;  %v367_v35 = vld [vmem:[%s1463_s27 + $0xe0] sm:$0xff]  ;;  %v369_v36 = vld [vmem:[%s1463_s27 + $0xf0] sm:$0xff] }
  0x5d   : > { %436 = vmatpush1.msra.mxu0 %v379_v23  ;;  %513 = vmatpush1.msra.mxu1 %v381_v24  ;;  %v364_v37 = vld [vmem:[%s1463_s27 + $0xc8] sm:$0xff]  ;;  %v366_v38 = vld [vmem:[%s1463_s27 + $0xd8] sm:$0xff]  ;;  %v363_v39 = vld [vmem:[%s1463_s27 + $0xc0] sm:$0xff] }
  0x5e   : > { %437 = vmatprep.subr.mxu0 %v376_v25  ;;  %514 = vmatprep.subr.mxu1 %v378_v26  ;;  %v365_v40 = vld [vmem:[%s1463_s27 + $0xd0] sm:$0xff]  ;;  %v360_v41 = vld [vmem:[%s1463_s27 + $0xa8] sm:$0xff]  ;;  %v362_v42 = vld [vmem:[%s1463_s27 + $0xb8] sm:$0xff] }
  0x5f   : > { %438 = vmatpush1.msra.mxu0 %v375_v27  ;;  %515 = vmatpush1.msra.mxu1 %v377_v28  ;;  %v359_v43 = vld [vmem:[%s1463_s27 + $0xa0] sm:$0xff]  ;;  %v361_v44 = vld [vmem:[%s1463_s27 + $0xb0] sm:$0xff]  ;;  %v356_v45 = vld [vmem:[%s1463_s27 + $0x88] sm:$0xff] }
  0x60   : > { %439 = vmatprep.subr.mxu0 %v372_v29  ;;  %516 = vmatprep.subr.mxu1 %v374_v30  ;;  %v358_v46 = vld [vmem:[%s1463_s27 + $0x98] sm:$0xff]  ;;  %v355_v47 = vld [vmem:[%s1463_s27 + $0x80] sm:$0xff]  ;;  %v357_v48 = vld [vmem:[%s1463_s27 + $0x90] sm:$0xff] }
  0x61   : > { %440 = vmatpush1.msra.mxu0 %v371_v31  ;;  %517 = vmatpush1.msra.mxu1 %v373_v32  ;;  %v352_v49 = vld [vmem:[%s1463_s27 + $0x68] sm:$0xff]  ;;  %v354_v50 = vld [vmem:[%s1463_s27 + $0x78] sm:$0xff]  ;;  %v351_v51 = vld [vmem:[%s1463_s27 + $0x60] sm:$0xff] }
  0x62   : > { %441 = vmatprep.subr.mxu0 %v368_v33  ;;  %518 = vmatprep.subr.mxu1 %v370_v34  ;;  %v353_v52 = vld [vmem:[%s1463_s27 + $0x70] sm:$0xff]  ;;  %v348_v53 = vld [vmem:[%s1463_s27 + $0x48] sm:$0xff]  ;;  %v350_v54 = vld [vmem:[%s1463_s27 + $0x58] sm:$0xff] }
  0x63   : > { %442 = vmatpush1.msra.mxu0 %v367_v35  ;;  %519 = vmatpush1.msra.mxu1 %v369_v36  ;;  %v347_v55 = vld [vmem:[%s1463_s27 + $0x40] sm:$0xff]  ;;  %v349_v56 = vld [vmem:[%s1463_s27 + $0x50] sm:$0xff]  ;;  %v344_v57 = vld [vmem:[%s1463_s27 + $0x28] sm:$0xff] }
  0x64   : > { %443 = vmatprep.subr.mxu0 %v364_v37  ;;  %520 = vmatprep.subr.mxu1 %v366_v38  ;;  %v346_v58 = vld [vmem:[%s1463_s27 + $0x38] sm:$0xff]  ;;  %v343_v59 = vld [vmem:[%s1463_s27 + $0x20] sm:$0xff]  ;;  %v345_v60 = vld [vmem:[%s1463_s27 + $0x30] sm:$0xff] }
  0x65   : > { %444 = vmatpush1.msra.mxu0 %v363_v39  ;;  %521 = vmatpush1.msra.mxu1 %v365_v40  ;;  %v340_v61 = vld [vmem:[%s1463_s27 + $0x8] sm:$0xff]  ;;  %v342_v62 = vld [vmem:[%s1463_s27 + $0x18] sm:$0xff]  ;;  %v339_v63 = vld [vmem:[%s1463_s27] sm:$0xff] }
  0x66   : > { %445 = vmatprep.subr.mxu0 %v360_v41  ;;  %522 = vmatprep.subr.mxu1 %v362_v42  ;;  %v341_v0 = vld [vmem:[%s1463_s27 + $0x10] sm:$0xff]  ;;  %v620_v3 = vld [vmem:[%s1476_s26 + $0xf8] sm:$0xff]  ;;  %v618_v12 = vld [vmem:[%s1476_s26 + $0xe8] sm:$0xff] }
  0x67   : > { %446 = vmatpush1.msra.mxu0 %v359_v43  ;;  %523 = vmatpush1.msra.mxu1 %v361_v44  ;;  %v337_v1 = vld [vmem:[#allocation3] sm:$0xff]  ;;  %v652_v4 = vld [vmem:[%s1476_s26 + $0x1f8] sm:$0xff]  ;;  %v650_v13 = vld [vmem:[%s1476_s26 + $0x1e8] sm:$0xff] }
  0x68   : > { %447 = vmatprep.subr.mxu0 %v356_v45  ;;  %524 = vmatprep.subr.mxu1 %v358_v46  ;;  %v604_v5 = vld [vmem:[%s1476_s26 + $0x78] sm:$0xff]  ;;  %v619_v8 = vld [vmem:[%s1476_s26 + $0xf0] sm:$0xff]  ;;  %v602_v14 = vld [vmem:[%s1476_s26 + $0x68] sm:$0xff] }
  0x69   : > { %448 = vmatpush1.msra.mxu0 %v355_v47  ;;  %525 = vmatpush1.msra.mxu1 %v357_v48  ;;  %v636_v6 = vld [vmem:[%s1476_s26 + $0x178] sm:$0xff]  ;;  %v651_v9 = vld [vmem:[%s1476_s26 + $0x1f0] sm:$0xff]  ;;  %v634_v15 = vld [vmem:[%s1476_s26 + $0x168] sm:$0xff] }
  0x6a   : > { %449 = vmatprep.subr.mxu0 %v352_v49  ;;  %526 = vmatprep.subr.mxu1 %v354_v50  ;;  %v338_v7 = vld [vmem:[#allocation3 + $0x8] sm:$0xff]  ;;  %v603_v10 = vld [vmem:[%s1476_s26 + $0x70] sm:$0xff]  ;;  %v617_v16 = vld [vmem:[%s1476_s26 + $0xe0] sm:$0xff] }
  0x6b   : > { %450 = vmatpush1.msra.mxu0 %v351_v51  ;;  %527 = vmatpush1.msra.mxu1 %v353_v52  ;;  %v635_v11 = vld [vmem:[%s1476_s26 + $0x170] sm:$0xff]  ;;  %v649_v17 = vld [vmem:[%s1476_s26 + $0x1e0] sm:$0xff]  ;;  %v616_v20 = vld [vmem:[%s1476_s26 + $0xd8] sm:$0xff] }
  0x6c   : > { %451 = vmatprep.subr.mxu0 %v348_v53  ;;  %528 = vmatprep.subr.mxu1 %v350_v54  ;;  %v601_v18 = vld [vmem:[%s1476_s26 + $0x60] sm:$0xff]  ;;  %v648_v21 = vld [vmem:[%s1476_s26 + $0x1d8] sm:$0xff]  ;;  %v615_v24 = vld [vmem:[%s1476_s26 + $0xd0] sm:$0xff] }
  0x6d   : > { %452 = vmatpush1.msra.mxu0 %v347_v55  ;;  %529 = vmatpush1.msra.mxu1 %v349_v56  ;;  %v633_v19 = vld [vmem:[%s1476_s26 + $0x160] sm:$0xff]  ;;  %v600_v22 = vld [vmem:[%s1476_s26 + $0x58] sm:$0xff]  ;;  %v647_v25 = vld [vmem:[%s1476_s26 + $0x1d0] sm:$0xff] }
  0x6e   : > { %453 = vmatprep.subr.mxu0 %v344_v57  ;;  %530 = vmatprep.subr.mxu1 %v346_v58  ;;  %v632_v23 = vld [vmem:[%s1476_s26 + $0x158] sm:$0xff]  ;;  %v599_v26 = vld [vmem:[%s1476_s26 + $0x50] sm:$0xff]  ;;  %v614_v28 = vld [vmem:[%s1476_s26 + $0xc8] sm:$0xff] }
  0x6f   : > { %454 = vmatpush1.msra.mxu0 %v343_v59  ;;  %531 = vmatpush1.msra.mxu1 %v345_v60  ;;  %v631_v27 = vld [vmem:[%s1476_s26 + $0x150] sm:$0xff]  ;;  %v646_v29 = vld [vmem:[%s1476_s26 + $0x1c8] sm:$0xff]  ;;  %v613_v32 = vld [vmem:[%s1476_s26 + $0xc0] sm:$0xff] }
  0x70   : > { %455 = vmatprep.subr.mxu0 %v340_v61  ;;  %532 = vmatprep.subr.mxu1 %v342_v62  ;;  %v598_v30 = vld [vmem:[%s1476_s26 + $0x48] sm:$0xff]  ;;  %v645_v33 = vld [vmem:[%s1476_s26 + $0x1c0] sm:$0xff]  ;;  %v612_v36 = vld [vmem:[%s1476_s26 + $0xb8] sm:$0xff] }
  0x71   : > { %456 = vmatpush1.msra.mxu0 %v339_v63  ;;  %489 = vmatprep.mubr.f32.mxu0 %v1302_v2  ;;  %v630_v31 = vld [vmem:[%s1476_s26 + $0x148] sm:$0xff]  ;;  %v597_v34 = vld [vmem:[%s1476_s26 + $0x40] sm:$0xff]  ;;  %v644_v37 = vld [vmem:[%s1476_s26 + $0x1b8] sm:$0xff] }
  0x72   : > { %533 = vmatpush1.msra.mxu1 %v341_v0  ;;  %566 = vmatprep.mubr.f32.mxu1 %v1302_v2  ;;  %v629_v35 = vld [vmem:[%s1476_s26 + $0x140] sm:$0xff]  ;;  %v596_v38 = vld [vmem:[%s1476_s26 + $0x38] sm:$0xff]  ;;  %v611_v40 = vld [vmem:[%s1476_s26 + $0xb0] sm:$0xff] }
  0x73   : > { %490 = vmatmul.mubr.f32.vlgmr.msra.gmra.mxu0 %v337_v1  ;;  %567 = vmatmul.mubr.f32.vlgmr.msra.gmra.mxu1 %v337_v1  ;;  %v628_v39 = vld [vmem:[%s1476_s26 + $0x138] sm:$0xff]  ;;  %v643_v41 = vld [vmem:[%s1476_s26 + $0x1b0] sm:$0xff]  ;;  %v610_v44 = vld [vmem:[%s1476_s26 + $0xa8] sm:$0xff] }
  0x74   : > { %495 = vmatprep.mubr.f32.mxu0 %v1302_v2  ;;  %572 = vmatprep.mubr.f32.mxu1 %v1302_v2  ;;  %v595_v42 = vld [vmem:[%s1476_s26 + $0x30] sm:$0xff]  ;;  %v642_v45 = vld [vmem:[%s1476_s26 + $0x1a8] sm:$0xff]  ;;  %v609_v48 = vld [vmem:[%s1476_s26 + $0xa0] sm:$0xff] }
  0x75   : > { %964 = vmatprep.subr.mxu0 %v620_v3  ;;  %1002 = vmatprep.subr.mxu1 %v652_v4  ;;  %v627_v43 = vld [vmem:[%s1476_s26 + $0x130] sm:$0xff]  ;;  %v594_v46 = vld [vmem:[%s1476_s26 + $0x28] sm:$0xff]  ;;  %v641_v49 = vld [vmem:[%s1476_s26 + $0x1a0] sm:$0xff]  ;;  %v405_v4 = vlaneseq }
  0x76   : > { %965 = vmatpush3.msra.mxu0 %v604_v5  ;;  %1003 = vmatpush3.msra.mxu1 %v636_v6  ;;  %v626_v47 = vld [vmem:[%s1476_s26 + $0x128] sm:$0xff]  ;;  %v593_v50 = vld [vmem:[%s1476_s26 + $0x20] sm:$0xff]  ;;  %v608_v52 = vld [vmem:[%s1476_s26 + $0x98] sm:$0xff] }
  0x77   : > { %496 = vmatmul.mubr.f32.gmra.mxu0 %v338_v7  ;;  %573 = vmatmul.mubr.f32.gmra.mxu1 %v338_v7  ;;  %v625_v51 = vld [vmem:[%s1476_s26 + $0x120] sm:$0xff]  ;;  %v640_v53 = vld [vmem:[%s1476_s26 + $0x198] sm:$0xff]  ;;  %v607_v56 = vld [vmem:[%s1476_s26 + $0x90] sm:$0xff]  ;;  %v406_v5 = vshrl.u32 %v405_v4, 7 }
  0x78   : > { %966 = vmatprep.subr.mxu0 %v619_v8  ;;  %1004 = vmatprep.subr.mxu1 %v651_v9  ;;  %v592_v54 = vld [vmem:[%s1476_s26 + $0x18] sm:$0xff]  ;;  %v639_v57 = vld [vmem:[%s1476_s26 + $0x190] sm:$0xff]  ;;  %v606_v60 = vld [vmem:[%s1476_s26 + $0x88] sm:$0xff] }
  0x79   : > { %967 = vmatpush3.msra.mxu0 %v603_v10  ;;  %1005 = vmatpush3.msra.mxu1 %v635_v11  ;;  %v624_v55 = vld [vmem:[%s1476_s26 + $0x118] sm:$0xff]  ;;  %v591_v58 = vld [vmem:[%s1476_s26 + $0x10] sm:$0xff]  ;;  %v638_v61 = vld [vmem:[%s1476_s26 + $0x188] sm:$0xff]  ;;  %v407_v6 = vsub.s32 0, %v406_v5  ;;  %v415_v7 = vsub.s32 2, %v406_v5  ;;  %v411_v9 = vsub.s32 1, %v406_v5 }
  0x7a   : > { %968 = vmatprep.subr.mxu0 %v618_v12  ;;  %1006 = vmatprep.subr.mxu1 %v650_v13  ;;  %v623_v59 = vld [vmem:[%s1476_s26 + $0x110] sm:$0xff]  ;;  %v590_v62 = vld [vmem:[%s1476_s26 + $0x8] sm:$0xff]  ;;  %v605_v0 = vld [vmem:[%s1476_s26 + $0x80] sm:$0xff]  ;;  %v419_v10 = vsub.s32 3, %v406_v5 }
  0x7b   : > { %969 = vmatpush3.msra.mxu0 %v602_v14  ;;  %1007 = vmatpush3.msra.mxu1 %v634_v15  ;;  %v622_v63 = vld [vmem:[%s1476_s26 + $0x108] sm:$0xff]  ;;  %v637_v1 = vld [vmem:[%s1476_s26 + $0x180] sm:$0xff] }
  0x7c   : > { %970 = vmatprep.subr.mxu0 %v617_v16  ;;  %1008 = vmatprep.subr.mxu1 %v649_v17  ;;  %v589_v2 = vld [vmem:[%s1476_s26] sm:$0xff] }
  0x7d   : > { %971 = vmatpush3.msra.mxu0 %v601_v18  ;;  %1009 = vmatpush3.msra.mxu1 %v633_v19  ;;  %v621_v3 = vld [vmem:[%s1476_s26 + $0x100] sm:$0xff] }
  0x7e   : > { %972 = vmatprep.subr.mxu0 %v616_v20  ;;  %1010 = vmatprep.subr.mxu1 %v648_v21  ;;  %v403_v8 = vld [vmem:[%s327_s17] sm:$0xf] }
  0x7f   : > { %973 = vmatpush3.msra.mxu0 %v600_v22  ;;  %1011 = vmatpush3.msra.mxu1 %v632_v23  ;;  %v408_v11 = vrot.slane %v403_v8, %v407_v6  ;;  %v416_v12 = vrot.slane %v403_v8, %v415_v7  ;;  %v412_v13 = vrot.slane %v403_v8, %v411_v9 }
  0x80   : > { %974 = vmatprep.subr.mxu0 %v615_v24  ;;  %1012 = vmatprep.subr.mxu1 %v647_v25  ;;  %v420_v14 = vrot.slane %v403_v8, %v419_v10 }
  0x81   : > { %975 = vmatpush3.msra.mxu0 %v599_v26  ;;  %1013 = vmatpush3.msra.mxu1 %v631_v27 }
  0x82   : > { %976 = vmatprep.subr.mxu0 %v614_v28  ;;  %1014 = vmatprep.subr.mxu1 %v646_v29 }
  0x83   : > { %977 = vmatpush3.msra.mxu0 %v598_v30  ;;  %1015 = vmatpush3.msra.mxu1 %v630_v31 }
  0x84   : > { %978 = vmatprep.subr.mxu0 %v613_v32  ;;  %1016 = vmatprep.subr.mxu1 %v645_v33 }
  0x85   : > { %979 = vmatpush3.msra.mxu0 %v597_v34  ;;  %1017 = vmatpush3.msra.mxu1 %v629_v35 }
  0x86   : > { %980 = vmatprep.subr.mxu0 %v612_v36  ;;  %1018 = vmatprep.subr.mxu1 %v644_v37 }
  0x87   : > { %981 = vmatpush3.msra.mxu0 %v596_v38  ;;  %1019 = vmatpush3.msra.mxu1 %v628_v39 }
  0x88   : > { %982 = vmatprep.subr.mxu0 %v611_v40  ;;  %1020 = vmatprep.subr.mxu1 %v643_v41 }
  0x89   : > { %983 = vmatpush3.msra.mxu0 %v595_v42  ;;  %1021 = vmatpush3.msra.mxu1 %v627_v43 }
  0x8a   : > { %984 = vmatprep.subr.mxu0 %v610_v44  ;;  %1022 = vmatprep.subr.mxu1 %v642_v45  ;;  %v587_v45 = vld [vmem:[#allocation2] sm:$0xff] }
  0x8b   : > { %985 = vmatpush3.msra.mxu0 %v594_v46  ;;  %1023 = vmatpush3.msra.mxu1 %v626_v47 }
  0x8c   : > { %986 = vmatprep.subr.mxu0 %v609_v48  ;;  %1024 = vmatprep.subr.mxu1 %v641_v49 }
  0x8d   : > { %987 = vmatpush3.msra.mxu0 %v593_v50  ;;  %1025 = vmatpush3.msra.mxu1 %v625_v51 }
  0x8e   : > { %988 = vmatprep.subr.mxu0 %v608_v52  ;;  %1026 = vmatprep.subr.mxu1 %v640_v53 }
  0x8f   : > { %989 = vmatpush3.msra.mxu0 %v592_v54  ;;  %1027 = vmatpush3.msra.mxu1 %v624_v55  ;;  %v588_v54 = vld [vmem:[#allocation2 + $0x8] sm:$0xff] }
  0x90   : > { %990 = vmatprep.subr.mxu0 %v607_v56  ;;  %1028 = vmatprep.subr.mxu1 %v639_v57 }
  0x91   : > { %991 = vmatpush3.msra.mxu0 %v591_v58  ;;  %1029 = vmatpush3.msra.mxu1 %v623_v59 }
  0x92   : > { %992 = vmatprep.subr.mxu0 %v606_v60  ;;  %1030 = vmatprep.subr.mxu1 %v638_v61 }
  0x93   : > { %993 = vmatpush3.msra.mxu0 %v590_v62  ;;  %1031 = vmatpush3.msra.mxu1 %v622_v63 }
  0x94   : > { %994 = vmatprep.subr.mxu0 %v605_v0  ;;  %1032 = vmatprep.subr.mxu1 %v637_v1 }
  0x95   : > { %995 = vmatpush3.msra.mxu0 %v589_v2  ;;  %1033 = vmatpush3.msra.mxu1 %v621_v3 }
 0x133   : > { %v491_v15 = vpop.f32.mrf.mxu0  ;;  %v568_v16 = vpop.f32.mrf.mxu1 }
 0x134   : > { %v492_v17 = vadd.f32 %v491_v15, %v408_v11  ;;  %v569_v18 = vadd.f32 %v568_v16, %v416_v12 }
 0x135   : > { %v493_v19 = vpop.f32.mrf.mxu0  ;;  %v570_v20 = vpop.f32.mrf.mxu1 }
 0x136   : > { %v494_v21 = vadd.f32 %v493_v19, %v412_v13  ;;  %v571_v22 = vadd.f32 %v570_v20, %v420_v14  ;;  %v579_v27 = vmax.f32 %v492_v17, 0.0  ;;  %v581_v28 = vmax.f32 %v569_v18, 0.0 }
 0x137   : > { %v497_v23 = vpop.f32.mrf.mxu0  ;;  %v574_v24 = vpop.f32.mrf.mxu1 }
 0x138   : > { %v580_v25 = vmax.f32 %v494_v21, 0.0  ;;  %v582_v26 = vmax.f32 %v571_v22, 0.0  ;;  %v498_v29 = vadd.f32 %v497_v23, %v408_v11  ;;  %v575_v30 = vadd.f32 %v574_v24, %v416_v12 }
 0x139   : > { %v499_v31 = vpop.f32.mrf.mxu0  ;;  %v576_v32 = vpop.f32.mrf.mxu1 }
 0x13a   : > { %v500_v33 = vadd.f32 %v499_v31, %v412_v13  ;;  %v577_v34 = vadd.f32 %v576_v32, %v420_v14  ;;  %717 = vmatprep.mubr.f32.mxu0 %v580_v25  ;;  %792 = vmatprep.mubr.f32.mxu1 %v582_v26  ;;  %v583_v37 = vmax.f32 %v498_v29, 0.0  ;;  %v585_v38 = vmax.f32 %v575_v30, 0.0 }
 0x13b   : > { %718 = vmatmul.mubr.f32.vlgmr.msra.gmra.mxu0 %v579_v27  ;;  %793 = vmatmul.mubr.f32.vlgmr.msra.gmra.mxu1 %v581_v28 }
 0x13c   : > { %v584_v35 = vmax.f32 %v500_v33, 0.0  ;;  %v586_v36 = vmax.f32 %v577_v34, 0.0 }
 0x13e   : > { %722 = vmatprep.mubr.f32.mxu0 %v584_v35  ;;  %797 = vmatprep.mubr.f32.mxu1 %v586_v36 }
 0x13f   : > { %723 = vmatmul.mubr.f32.gmra.mxu0 %v583_v37  ;;  %798 = vmatmul.mubr.f32.gmra.mxu1 %v585_v38 }
 0x1fb   : > { %v996_v39 = vpop.f32.mrf.mxu0  ;;  %v1034_v40 = vpop.f32.mrf.mxu1 }
 0x1fd   : > { %v997_v41 = vpop.f32.mrf.mxu0  ;;  %v1035_v42 = vpop.f32.mrf.mxu1 }
 0x1fe   : > { %v998_v43 = vadd.f32 %v997_v41, %v996_v39  ;;  %v1036_v44 = vadd.f32 %v1035_v42, %v1034_v40 }
 0x1ff   : > { %v999_v46 = vpop.f32.mrf.mxu0  ;;  %v1037_v47 = vpop.f32.mrf.mxu1 }
 0x200   : > { %v795_v48 = vadd.f32 %v1036_v44, %v998_v43 }
 0x201   : > { %v1000_v49 = vpop.f32.mrf.mxu0  ;;  %v1038_v50 = vpop.f32.mrf.mxu1 }
 0x202   : > { %v803_v51 = vadd.f32 %v795_v48, %v587_v45  ;;  %v1001_v52 = vadd.f32 %v1000_v49, %v999_v46  ;;  %v1039_v53 = vadd.f32 %v1038_v50, %v1037_v47 }
 0x204   : > { %805 = vst [vmem:[#allocation2] sm:$0xff] %v803_v51  ;;  %v800_v55 = vadd.f32 %v1039_v53, %v1001_v52  ;;  %810 = sbr.rel (%p956_p2) target bundleno = 531 (0x213), region = 60 }
 0x206   : > { %v804_v56 = vadd.f32 %v800_v55, %v588_v54 }
 0x208   : > { %806 = vst [vmem:[#allocation2 + $0x8] sm:$0xff] %v804_v56 }
 0x209   : > { %v957_v58 = vld [vmem:[%s1650_s4] ss:$0 sm:$0xff] }
 0x20b   : > { %v811_v57 = vld [vmem:[#allocation2] sm:$0xff] }
 0x20c   : > { %v820_v60 = vadd.f32 %v957_v58, %v811_v57 }
 0x20e   : > { %822 = vst [vmem:[#allocation9] sm:$0xff] %v820_v60 }
 0x20f   : > { %v812_v59 = vld [vmem:[#allocation2 + $0x8] sm:$0xff] }
 0x210   : > { %v821_v61 = vadd.f32 %v957_v58, %v812_v59 }
 0x212   : > { %823 = vst [vmem:[#allocation9 + $0x8] sm:$0xff] %v821_v61 }
 0x213 PF: > { %p1066_p5 = scmp.eq.s32.totalorder %s1403_s28, 1  ;;  %s1303_s12 = smov [#allocation9]  }
 0x214   : > { %s833_s14 = sshll.u32 %s1303_s12, 4  ;;  %s834_s14 = int_to_ptr.vmem [resolvable:$true] %s833_s14 }
 0x215   : > { %s1209_s16 = scalar_lea.vmem %s834_s14, 256  ;;  %p1216_p11 = scmp.lt.s32.totalorder %s834_s14, %s834_s14 }
 0x216   : > { %p1210_p8 = scmp.ne.s32.totalorder %s834_s14, %s1209_s16  ;;  %p1217_p12 = scmp.lt.s32.totalorder %s1209_s16, %s1209_s16 }
 0x218   : > { %p1211_p10 = pnand %p1210_p8, %p1066_p5  ;;  %p1218_p13 = por %p1217_p12, %p1216_p11 }
 0x21a   : > { %p1212_p9 = pneg %p1211_p10 }
 0x21c   : > { %p1219_p0 = pnand %p1218_p13, %p1212_p9 }
 0x21e   : > { %1222 = shalt.err (!%p1219_p0)
}
 0x21f   : > { %s1304_s21 = smov 128   ;;  %s1305_s9 = smov 8  }
 0x220   : > { %1049 = dma.vmem_to_hbm [thread:$0]  (%p1066_p5), %s834_s14, 256, %s1651_s5, [#allocation5], %s1304_s21, %s1304_s21, %s1305_s9  }
 0x221   : > { %1266 = dma.done.wait (%p1066_p5), [#allocation5], 256  }
 0x222   : > { %1268 = vsyncadd (%p1066_p5), [#allocation5], 4294967040 }
 0x223 PF: > { %s20_s23 = sadd.s32 1, %s1291_s23   ;;  %s1656_s18 = smov %s1275_s19 }
 0x224   : > { %p17_p1 = scmp.ge.s32.totalorder %s20_s23, 4   ;;  %s1657_s19 = smov %s1279_s20 }
 0x225   : > { %s1658_s20 = smov %s1380_s30  ;;  %s1659_s21 = smov %s1287_s22 }
 0x226   : > { %s1660_s22 = smov %s1662_s24  ;;  %19 = sbr.rel (!%p17_p1) target bundleno = 6 (0x6), region = 106 }
 0x22b   :  { %849 = vsyncpa [#allocation4], 1 }
 0x22c   :  { %851 = vsyncpa [#allocation4 + $0x1], 1 }
 0x22d   :  { %852 = vsyncpa [#allocation7], 1 }
 0x22e   :  { %854 = vsyncpa [#allocation7 + $0x1], 1 }
 0x22f   :  { %855 = vsyncpa [#allocation5], 1 }
 0x230   :  { %857 = vsyncpa [#allocation5 + $0x1], 1 }

</bundles_post_ra>
